<compile_context>
chip_gen: v6e
topology: v6e:2x2x1
jax: 0.10.0
libtpu: 0.0.40
codegen_flags: <defaults>
</compile_context>

<pallas_src>
import functools

import jax
import jax.numpy as jnp
from jax import lax
from jax.experimental import pallas as pl
from jax.experimental.pallas import tpu as pltpu


def _pick_tc(C, HW, itemsize, target_bytes):
    """Channel-group size per grid step.

    tc must be a multiple of 8 (sublane tile) or equal to C (full-dim block).
    Sized so the input block lands around `target_bytes` (~2 MiB): big enough
    that the ~0.35 us/step grid overhead is negligible, small enough that
    2x(input+output) double buffers stay well under scoped-VMEM limits on
    v5e/v6e (128 MiB) and v7x (64 MiB).
    """
    want = max(1, target_bytes // max(1, HW * itemsize))
    if want >= C or C <= 8:
        return C
    return max(8, min(C, (want // 8) * 8))


def _frelu_kernel(x_ref, w_ref, b_ref, o_ref, *, W, compute_dtype):
    """One (batch, channel-group) tile per grid step, vectorized over channels.

    x_ref : (1, tc, H*W)  input tile, channels on sublanes, flattened H*W on lanes
    w_ref : (tc, 9)       VMEM: BN-scale-folded depthwise taps, row-major (ki*3+kj)
    b_ref : (tc, 1)       VMEM: folded bias = beta + (conv_b - mean) * scale
    o_ref : (1, tc, H*W)  output tile
    """
    HW = x_ref.shape[2]

    x = x_ref[0].astype(compute_dtype)        # (tc, HW)
    w = w_ref[...].astype(compute_dtype)      # (tc, 9)
    b = b_ref[...].astype(compute_dtype)      # (tc, 1)

    zero = jnp.zeros((), compute_dtype)

    # SAME-padding boundary masks over the flattened H*W lane axis
    # (built once per grid step at (1, HW); broadcast along sublanes in where).
    pos = lax.broadcasted_iota(jnp.int32, (1, HW), 1)
    col = pos % W
    not_left = col > 0
    not_right = col < (W - 1)
    not_top = pos >= W              # row > 0
    not_bot = pos < (HW - W)        # row < H - 1

    # Row-shifted planes: lane roll by +-W over the flattened axis + masking.
    x_u = jnp.where(not_top, pltpu.roll(x, shift=W, axis=1), zero)       # x[i-1, j]
    x_d = jnp.where(not_bot, pltpu.roll(x, shift=HW - W, axis=1), zero)  # x[i+1, j]

    acc = None
    for ki, r in enumerate((x_u, x, x_d)):
        # Column shifts: lane roll by +-1 + masking.
        r_l = jnp.where(not_left, pltpu.roll(r, shift=1, axis=1), zero)        # r[., j-1]
        r_r = jnp.where(not_right, pltpu.roll(r, shift=HW - 1, axis=1), zero)  # r[., j+1]
        for kj, t in enumerate((r_l, r, r_r)):
            k = ki * 3 + kj
            term = t * w[:, k:k + 1]            # (tc, HW) * (tc, 1)
            acc = term if acc is None else acc + term

    y = acc + b                                  # (tc, HW) + (tc, 1)
    o_ref[0] = jnp.maximum(x, y).astype(o_ref.dtype)


def frelu_pallas(x_nchw, conv_w, conv_b, bn_gamma, bn_beta, bn_mean, bn_var,
                 eps=1e-5, target_block_bytes=2 << 20):
    """FReLU forward (eval-mode BN). x_nchw: (N, C, H, W). conv_w: (C, 1, 3, 3)."""
    N, C, H, W = x_nchw.shape
    HW = H * W

    # --- tiny wrapper-side param folding (no activation-sized ops) ------------
    scale = (bn_gamma * lax.rsqrt(bn_var + eps)).astype(jnp.float32)        # (C,)
    bias = (bn_beta + (conv_b - bn_mean) * scale).astype(jnp.float32)       # (C,)
    bias = bias.reshape(C, 1)
    w_folded = (conv_w[:, 0, :, :].astype(jnp.float32)
                * scale[:, None, None]).reshape(C, 9)                       # (C, 9)

    # bf16 activations -> bf16 VPU path on v6e/v7x (v5e upcasts transparently).
    if x_nchw.dtype in (jnp.bfloat16, jnp.float16):
        compute_dtype = x_nchw.dtype
    else:
        compute_dtype = jnp.float32

    itemsize = jnp.dtype(x_nchw.dtype).itemsize
    tc = _pick_tc(C, HW, itemsize, target_block_bytes)
    grid = (N, pl.cdiv(C, tc))   # partial last channel block handled by Pallas

    # Metadata-only reshape for contiguous NCHW: no extra HBM pass.
    x_flat = x_nchw.reshape(N, C, HW)

    kernel = functools.partial(_frelu_kernel, W=W, compute_dtype=compute_dtype)

    out = pl.pallas_call(
        kernel,
        out_shape=jax.ShapeDtypeStruct((N, C, HW), x_nchw.dtype),
        grid_spec=pltpu.PrefetchScalarGridSpec(
            num_scalar_prefetch=0,
            grid=grid,
            in_specs=[
                pl.BlockSpec((1, tc, HW), lambda n, c: (n, c, 0)),
                pl.BlockSpec((tc, 9), lambda n, c: (c, 0)),   # folded taps (VMEM)
                pl.BlockSpec((tc, 1), lambda n, c: (c, 0)),   # folded bias (VMEM)
            ],
            out_specs=pl.BlockSpec((1, tc, HW), lambda n, c: (n, c, 0)),
        ),
        compiler_params=pltpu.CompilerParams(
            dimension_semantics=("parallel", "parallel")),
    )(x_flat, w_folded, bias)

    return out.reshape(N, C, H, W)


def frelu_reference(x_nchw, conv_w, conv_b, bn_gamma, bn_beta, bn_mean, bn_var,
                    eps=1e-5):
    """Pure-JAX reference (NCHW), mirrors PyTorch FReLu in eval mode."""
    C = x_nchw.shape[1]
    y = lax.conv_general_dilated(
        x_nchw, conv_w, window_strides=(1, 1), padding="SAME",
        feature_group_count=C,
        dimension_numbers=("NCHW", "OIHW", "NCHW"))
    y = y + conv_b.reshape(1, C, 1, 1)
    y = (y - bn_mean.reshape(1, C, 1, 1)) * lax.rsqrt(
        bn_var.reshape(1, C, 1, 1) + eps)
    y = y * bn_gamma.reshape(1, C, 1, 1) + bn_beta.reshape(1, C, 1, 1)
    return jnp.maximum(x_nchw, y)


if __name__ == "__main__":
    key = jax.random.PRNGKey(0)

    def make_params(k, C):
        k_w, k_b, k_g, k_bt, k_m, k_v = jax.random.split(k, 6)
        conv_w = 0.1 * jax.random.normal(k_w, (C, 1, 3, 3), jnp.float32)
        conv_b = 0.1 * jax.random.normal(k_b, (C,), jnp.float32)
        bn_gamma = 1.0 + 0.1 * jax.random.normal(k_g, (C,), jnp.float32)
        bn_beta = 0.1 * jax.random.normal(k_bt, (C,), jnp.float32)
        bn_mean = 0.1 * jax.random.normal(k_m, (C,), jnp.float32)
        bn_var = jnp.abs(jax.random.normal(k_v, (C,), jnp.float32)) + 0.5
        return conv_w, conv_b, bn_gamma, bn_beta, bn_mean, bn_var

    k1, k2, kx1, kx2 = jax.random.split(key, 4)

    # Test 1: module-consistent small shape; single full-channel block per batch.
    N, C, H, W = 2, 4, 16, 16
    x = jax.random.normal(kx1, (N, C, H, W), jnp.float32)
    params = make_params(k1, C)
    out = jax.block_until_ready(frelu_pallas(x, *params))
    ref = frelu_reference(x, *params)
    assert out.shape == (N, C, H, W)
    assert jnp.allclose(out, ref, atol=1e-4, rtol=1e-4), "mismatch vs reference (test 1)"

    # Test 2: awkward channel count exercising tc=8 blocks + cdiv partial last block.
    N2, C2, H2, W2 = 1, 20, 8, 8
    x2 = jax.random.normal(kx2, (N2, C2, H2, W2), jnp.float32)
    params2 = make_params(k2, C2)
    out2 = jax.block_until_ready(
        frelu_pallas(x2, *params2, target_block_bytes=2048))
    ref2 = frelu_reference(x2, *params2)
    assert jnp.allclose(out2, ref2, atol=1e-4, rtol=1e-4), "mismatch vs reference (test 2)"

    print("KERNEL_OK")
</pallas_src>

<mosaic_0001>
module attributes {stable_mosaic.version = 11 : i64} {
  func.func @_frelu_kernel(%arg0: i32, %arg1: i32, %arg2: memref<1x4x256xf32, #tpu.memory_space<vmem>>, %arg3: memref<4x9xf32, #tpu.memory_space<vmem>>, %arg4: memref<4x1xf32, #tpu.memory_space<vmem>>, %arg5: memref<1x4x256xf32, #tpu.memory_space<vmem>>) attributes {dimension_semantics = [#tpu.dimension_semantics<parallel>, #tpu.dimension_semantics<parallel>], iteration_bounds = array<i64: 2, 1>, scalar_prefetch = 0 : i64, scratch_operands = 0 : i64, tpu.core_type = #tpu.core_type<tc>, window_params = [{transform_indices = @transform_0, window_bounds = array<i64: 1, 4, 256>}, {transform_indices = @transform_1, window_bounds = array<i64: 4, 9>}, {transform_indices = @transform_2, window_bounds = array<i64: 4, 1>}, {transform_indices = @transform_3, window_bounds = array<i64: 1, 4, 256>}]} {
    %c0 = arith.constant 0 : index
    %c0_0 = arith.constant 0 : index
    %c0_1 = arith.constant 0 : index
    %0 = vector.load %arg2[%c0, %c0_0, %c0_1] : memref<1x4x256xf32, #tpu.memory_space<vmem>>, vector<1x4x256xf32>
    %1 = vector.shape_cast %0 : vector<1x4x256xf32> to vector<4x256xf32>
    %c0_2 = arith.constant 0 : index
    %c0_3 = arith.constant 0 : index
    %2 = vector.load %arg3[%c0_2, %c0_3] : memref<4x9xf32, #tpu.memory_space<vmem>>, vector<4x9xf32>
    %c0_4 = arith.constant 0 : index
    %c0_5 = arith.constant 0 : index
    %3 = vector.load %arg4[%c0_4, %c0_5] : memref<4x1xf32, #tpu.memory_space<vmem>>, vector<4x1xf32>
    %4 = tpu.iota {dimensions = array<i32: 1>} : vector<1x256xi32>
    %c16_i32 = arith.constant 16 : i32
    %c0_i32 = arith.constant 0 : i32
    %5 = arith.cmpi eq, %c16_i32, %c0_i32 : i32
    %c1_i32 = arith.constant 1 : i32
    %6 = arith.select %5, %c1_i32, %c16_i32 : i32
    %7 = vector.broadcast %6 : i32 to vector<1x256xi32>
    %8 = arith.remsi %4, %7 : vector<1x256xi32>
    %c0_i32_6 = arith.constant 0 : i32
    %9 = vector.broadcast %c0_i32_6 : i32 to vector<1x256xi32>
    %10 = arith.cmpi ne, %8, %9 : vector<1x256xi32>
    %c0_i32_7 = arith.constant 0 : i32
    %11 = vector.broadcast %c0_i32_7 : i32 to vector<1x256xi32>
    %12 = arith.cmpi slt, %8, %11 : vector<1x256xi32>
    %c0_i32_8 = arith.constant 0 : i32
    %13 = arith.cmpi slt, %6, %c0_i32_8 : i32
    %14 = vector.broadcast %13 : i1 to vector<1x256xi1>
    %15 = vector.broadcast %14 : vector<1x256xi1> to vector<1x256xi1>
    %16 = arith.xori %12, %15 : vector<1x256xi1>
    %17 = arith.andi %16, %10 : vector<1x256xi1>
    %18 = vector.broadcast %6 : i32 to vector<1x256xi32>
    %19 = arith.addi %8, %18 : vector<1x256xi32>
    %20 = arith.select %17, %19, %8 : vector<1x256xi1>, vector<1x256xi32>
    %c0_i32_9 = arith.constant 0 : i32
    %21 = vector.broadcast %c0_i32_9 : i32 to vector<1x256xi32>
    %22 = arith.cmpi sgt, %20, %21 : vector<1x256xi32>
    %c15_i32 = arith.constant 15 : i32
    %23 = vector.broadcast %c15_i32 : i32 to vector<1x256xi32>
    %24 = arith.cmpi slt, %20, %23 : vector<1x256xi32>
    %c16_i32_10 = arith.constant 16 : i32
    %25 = vector.broadcast %c16_i32_10 : i32 to vector<1x256xi32>
    %26 = arith.cmpi sge, %4, %25 : vector<1x256xi32>
    %c240_i32 = arith.constant 240 : i32
    %27 = vector.broadcast %c240_i32 : i32 to vector<1x256xi32>
    %28 = arith.cmpi slt, %4, %27 : vector<1x256xi32>
    %c16_i32_11 = arith.constant 16 : i32
    %29 = tpu.dynamic_rotate %1 by %c16_i32_11 dim 1 : vector<4x256xf32>, i32 -> vector<4x256xf32>
    %cst = arith.constant 0.000000e+00 : f32
    %30 = vector.shape_cast %26 : vector<1x256xi1> to vector<1x256xi1>
    %31 = vector.broadcast %30 : vector<1x256xi1> to vector<4x256xi1>
    %32 = vector.broadcast %cst : f32 to vector<4x256xf32>
    %33 = arith.select %31, %29, %32 : vector<4x256xi1>, vector<4x256xf32>
    %c240_i32_12 = arith.constant 240 : i32
    %34 = tpu.dynamic_rotate %1 by %c240_i32_12 dim 1 : vector<4x256xf32>, i32 -> vector<4x256xf32>
    %cst_13 = arith.constant 0.000000e+00 : f32
    %35 = vector.shape_cast %28 : vector<1x256xi1> to vector<1x256xi1>
    %36 = vector.broadcast %35 : vector<1x256xi1> to vector<4x256xi1>
    %37 = vector.broadcast %cst_13 : f32 to vector<4x256xf32>
    %38 = arith.select %36, %34, %37 : vector<4x256xi1>, vector<4x256xf32>
    %c1_i32_14 = arith.constant 1 : i32
    %39 = tpu.dynamic_rotate %33 by %c1_i32_14 dim 1 : vector<4x256xf32>, i32 -> vector<4x256xf32>
    %cst_15 = arith.constant 0.000000e+00 : f32
    %40 = vector.shape_cast %22 : vector<1x256xi1> to vector<1x256xi1>
    %41 = vector.broadcast %40 : vector<1x256xi1> to vector<4x256xi1>
    %42 = vector.broadcast %cst_15 : f32 to vector<4x256xf32>
    %43 = arith.select %41, %39, %42 : vector<4x256xi1>, vector<4x256xf32>
    %c255_i32 = arith.constant 255 : i32
    %44 = tpu.dynamic_rotate %33 by %c255_i32 dim 1 : vector<4x256xf32>, i32 -> vector<4x256xf32>
    %cst_16 = arith.constant 0.000000e+00 : f32
    %45 = vector.shape_cast %24 : vector<1x256xi1> to vector<1x256xi1>
    %46 = vector.broadcast %45 : vector<1x256xi1> to vector<4x256xi1>
    %47 = vector.broadcast %cst_16 : f32 to vector<4x256xf32>
    %48 = arith.select %46, %44, %47 : vector<4x256xi1>, vector<4x256xf32>
    %49 = vector.extract_strided_slice %2 {offsets = [0, 0], sizes = [4, 1], strides = [1, 1]} : vector<4x9xf32> to vector<4x1xf32>
    %50 = vector.broadcast %49 : vector<4x1xf32> to vector<4x256xf32>
    %51 = arith.mulf %43, %50 : vector<4x256xf32>
    %52 = vector.extract_strided_slice %2 {offsets = [0, 1], sizes = [4, 1], strides = [1, 1]} : vector<4x9xf32> to vector<4x1xf32>
    %53 = vector.broadcast %52 : vector<4x1xf32> to vector<4x256xf32>
    %54 = arith.mulf %33, %53 : vector<4x256xf32>
    %55 = arith.addf %51, %54 : vector<4x256xf32>
    %56 = vector.extract_strided_slice %2 {offsets = [0, 2], sizes = [4, 1], strides = [1, 1]} : vector<4x9xf32> to vector<4x1xf32>
    %57 = vector.broadcast %56 : vector<4x1xf32> to vector<4x256xf32>
    %58 = arith.mulf %48, %57 : vector<4x256xf32>
    %59 = arith.addf %55, %58 : vector<4x256xf32>
    %c1_i32_17 = arith.constant 1 : i32
    %60 = tpu.dynamic_rotate %1 by %c1_i32_17 dim 1 : vector<4x256xf32>, i32 -> vector<4x256xf32>
    %cst_18 = arith.constant 0.000000e+00 : f32
    %61 = vector.shape_cast %22 : vector<1x256xi1> to vector<1x256xi1>
    %62 = vector.broadcast %61 : vector<1x256xi1> to vector<4x256xi1>
    %63 = vector.broadcast %cst_18 : f32 to vector<4x256xf32>
    %64 = arith.select %62, %60, %63 : vector<4x256xi1>, vector<4x256xf32>
    %c255_i32_19 = arith.constant 255 : i32
    %65 = tpu.dynamic_rotate %1 by %c255_i32_19 dim 1 : vector<4x256xf32>, i32 -> vector<4x256xf32>
    %cst_20 = arith.constant 0.000000e+00 : f32
    %66 = vector.shape_cast %24 : vector<1x256xi1> to vector<1x256xi1>
    %67 = vector.broadcast %66 : vector<1x256xi1> to vector<4x256xi1>
    %68 = vector.broadcast %cst_20 : f32 to vector<4x256xf32>
    %69 = arith.select %67, %65, %68 : vector<4x256xi1>, vector<4x256xf32>
    %70 = vector.extract_strided_slice %2 {offsets = [0, 3], sizes = [4, 1], strides = [1, 1]} : vector<4x9xf32> to vector<4x1xf32>
    %71 = vector.broadcast %70 : vector<4x1xf32> to vector<4x256xf32>
    %72 = arith.mulf %64, %71 : vector<4x256xf32>
    %73 = arith.addf %59, %72 : vector<4x256xf32>
    %74 = vector.extract_strided_slice %2 {offsets = [0, 4], sizes = [4, 1], strides = [1, 1]} : vector<4x9xf32> to vector<4x1xf32>
    %75 = vector.broadcast %74 : vector<4x1xf32> to vector<4x256xf32>
    %76 = arith.mulf %1, %75 : vector<4x256xf32>
    %77 = arith.addf %73, %76 : vector<4x256xf32>
    %78 = vector.extract_strided_slice %2 {offsets = [0, 5], sizes = [4, 1], strides = [1, 1]} : vector<4x9xf32> to vector<4x1xf32>
    %79 = vector.broadcast %78 : vector<4x1xf32> to vector<4x256xf32>
    %80 = arith.mulf %69, %79 : vector<4x256xf32>
    %81 = arith.addf %77, %80 : vector<4x256xf32>
    %c1_i32_21 = arith.constant 1 : i32
    %82 = tpu.dynamic_rotate %38 by %c1_i32_21 dim 1 : vector<4x256xf32>, i32 -> vector<4x256xf32>
    %cst_22 = arith.constant 0.000000e+00 : f32
    %83 = vector.shape_cast %22 : vector<1x256xi1> to vector<1x256xi1>
    %84 = vector.broadcast %83 : vector<1x256xi1> to vector<4x256xi1>
    %85 = vector.broadcast %cst_22 : f32 to vector<4x256xf32>
    %86 = arith.select %84, %82, %85 : vector<4x256xi1>, vector<4x256xf32>
    %c255_i32_23 = arith.constant 255 : i32
    %87 = tpu.dynamic_rotate %38 by %c255_i32_23 dim 1 : vector<4x256xf32>, i32 -> vector<4x256xf32>
    %cst_24 = arith.constant 0.000000e+00 : f32
    %88 = vector.shape_cast %24 : vector<1x256xi1> to vector<1x256xi1>
    %89 = vector.broadcast %88 : vector<1x256xi1> to vector<4x256xi1>
    %90 = vector.broadcast %cst_24 : f32 to vector<4x256xf32>
    %91 = arith.select %89, %87, %90 : vector<4x256xi1>, vector<4x256xf32>
    %92 = vector.extract_strided_slice %2 {offsets = [0, 6], sizes = [4, 1], strides = [1, 1]} : vector<4x9xf32> to vector<4x1xf32>
    %93 = vector.broadcast %92 : vector<4x1xf32> to vector<4x256xf32>
    %94 = arith.mulf %86, %93 : vector<4x256xf32>
    %95 = arith.addf %81, %94 : vector<4x256xf32>
    %96 = vector.extract_strided_slice %2 {offsets = [0, 7], sizes = [4, 1], strides = [1, 1]} : vector<4x9xf32> to vector<4x1xf32>
    %97 = vector.broadcast %96 : vector<4x1xf32> to vector<4x256xf32>
    %98 = arith.mulf %38, %97 : vector<4x256xf32>
    %99 = arith.addf %95, %98 : vector<4x256xf32>
    %100 = vector.extract_strided_slice %2 {offsets = [0, 8], sizes = [4, 1], strides = [1, 1]} : vector<4x9xf32> to vector<4x1xf32>
    %101 = vector.broadcast %100 : vector<4x1xf32> to vector<4x256xf32>
    %102 = arith.mulf %91, %101 : vector<4x256xf32>
    %103 = arith.addf %99, %102 : vector<4x256xf32>
    %104 = vector.broadcast %3 : vector<4x1xf32> to vector<4x256xf32>
    %105 = arith.addf %103, %104 : vector<4x256xf32>
    %106 = arith.maximumf %1, %105 : vector<4x256xf32>
    %c0_25 = arith.constant 0 : index
    %c0_26 = arith.constant 0 : index
    %c0_27 = arith.constant 0 : index
    %107 = vector.load %arg5[%c0_25, %c0_26, %c0_27] : memref<1x4x256xf32, #tpu.memory_space<vmem>>, vector<1x4x256xf32>
    %108 = vector.shape_cast %107 : vector<1x4x256xf32> to vector<4x256xf32>
    %109 = vector.shape_cast %106 : vector<4x256xf32> to vector<1x4x256xf32>
    tpu.vector_store %arg5[%c0_25, %c0_26, %c0_27], %109 {strides = array<i32>} : memref<1x4x256xf32, #tpu.memory_space<vmem>>, vector<1x4x256xf32>,
    return
  }
  func.func @transform_0(%arg0: i32, %arg1: i32) -> (i32, i32, i32) {
    %c0_i32 = arith.constant 0 : i32
    %c0_i32_0 = arith.constant 0 : i32
    return %arg0, %arg1, %c0_i32 : i32, i32, i32
  }
  func.func @transform_1(%arg0: i32, %arg1: i32) -> (i32, i32) {
    %c0_i32 = arith.constant 0 : i32
    %c0_i32_0 = arith.constant 0 : i32
    return %arg1, %c0_i32 : i32, i32
  }
  func.func @transform_2(%arg0: i32, %arg1: i32) -> (i32, i32) {
    %c0_i32 = arith.constant 0 : i32
    %c0_i32_0 = arith.constant 0 : i32
    return %arg1, %c0_i32 : i32, i32
  }
  func.func @transform_3(%arg0: i32, %arg1: i32) -> (i32, i32, i32) {
    %c0_i32 = arith.constant 0 : i32
    %c0_i32_0 = arith.constant 0 : i32
    return %arg0, %arg1, %c0_i32 : i32, i32, i32
  }
}

</mosaic_0001>

<bundles_post_ra>
// kernel: tpu_custom_call.1
= control target key start
LH: loop header
LB: loop body
LE: loop exit
PB: predicated region body
PF: predicated region fallthrough
CT: control target
= control target key end

     0   :  { %8 = vsyncpa [#allocation3], 0  ;;  %s1097_s0 = inlined_call_operand.hbm [shape: f32[2,4,256], index: 0, kind: input, shape index: {}]   ;;  %s1098_s1 = inlined_call_operand.vmem [shape: f32[4,9], index: 1, kind: input, shape index: {}]   ;;  %s1099_s2 = inlined_call_operand.vmem [shape: f32[4,1], index: 2, kind: input, shape index: {}]   ;;  %s1100_s3 = inlined_call_operand.hbm [shape: f32[2,4,256], index: 3, kind: output, shape index: {}]  }
   0x1   :  { %10 = vsyncpa [#allocation3 + $0x1], 0 }
   0x2   :  { %11 = vsyncpa [#allocation4], 0 }
   0x3   :  { %13 = vsyncpa [#allocation4 + $0x1], 0  ;;  %s840_s12 = smov 0   ;;  %s842_s13 = smov 0  }
   0x4   :  { %s844_s14 = smov 0   ;;  %s846_s15 = smov 0  }
   0x5   :  { %s848_s16 = smov 0   ;;  %s850_s17 = smov 0  }
   0x6 LB: > { %s588_s18 = sadd.s32 4294967295, %s802_s17   ;;  %s589_s19 = sadd.s32 4294967294, %s802_s17   ;;  %s802_s17 = sphi %s850_s17, %s19_s17   ;;  %s798_s16 = sphi %s848_s16, %s1120_s16   ;;  %s794_s15 = sphi %s846_s15, %s1119_s15   ;;  %s790_s14 = sphi %s844_s14, %s1118_s14   ;;  %s786_s13 = sphi %s842_s13, %s1117_s13   ;;  %s782_s12 = sphi %s840_s12, %s1116_s12  }
   0x7   : > { %s31_s20 = sadd.s32 1, %s798_s16  ;;  %s40_s21 = sadd.s32 1, %s790_s14 }
   0x8   : > { %p33_p0 = scmp.ge.s32.totalorder %s31_s20, 2  ;;  %p47_p1 = scmp.ne.s32.totalorder %s790_s14, %s786_s13 }
   0x9   : > { %p48_p2 = scmp.eq.s32.totalorder %s802_s17, 0  ;;  %p53_p3 = scmp.ne.s32.totalorder %s786_s13, %s782_s12 }
   0xa   : > { %s1122_s20 = smov (%p33_p0, %s31_s20), 0  ;;  %p54_p5 = scmp.eq.s32.totalorder %s588_s18, 0 }
   0xb   : > { %p881_p4 = por %p48_p2, %p47_p1  ;;  %s35_s23 = ssub.s32 %s798_s16, %s1122_s20 }
   0xc   : > { %p131_p6 = scmp.eq.s32.totalorder %s588_s18, 1  ;;  %p38_p7 = scmp.eq.s32.totalorder %s35_s23, 0 }
   0xd   : > { %p887_p8 = por %p54_p5, %p53_p3  ;;  %p137_p10 = scmp.eq.s32.totalorder %s589_s19, 1 }
   0xe   : > { %p891_p9 = por %p131_p6, %p47_p1  ;;  %p619_p13 = scmp.lt.s32.totalorder %s802_s17, 2 }
   0xf   : > { %s896_s26 = scalar_select %p38_p7, %s790_s14, %s40_s21  }
  0x10   : > { %p898_p11 = por %p137_p10, %p53_p3  ;;  %s171_s28 = sand.u32 1, %s790_s14  }
  0x11   : > { %s594_s29 = sshll.u32 %s171_s28, 3  ;;  %s605_s30 = sshll.u32 %s798_s16, 7 }
  0x12   : > { %s1104_s27 = scalar_select %p898_p11, 1, 0 }
  0x13   : > { %s183_s6 = scalar_lea.hbm %s1097_s0, %s605_s30  ;;  %s175_s7 = scalar_lea.vmem [#allocation2], %s594_s29 }
  0x14   : > { %s185_s8 = sshll.u32 %s175_s7, 4  ;;  %p911_p0 = pnand %p619_p13, %p881_p4  ;;  %s186_s8 = int_to_ptr.vmem [resolvable:$true] %s185_s8 }
  0x15   : > { %p597_p1 = scmp.ge.s32.totalorder %s802_s17, 1  ;;  %p190_p2 = scmp.lt.s32.totalorder %s802_s17, 3 }
  0x16   : > { %s172_s10 = scalar_lea.sflag [#allocation3], %s171_s28  ;;  %p696_p3 = pneg %p911_p0 }
  0x17   : > { %s707_s11 = scalar_lea.vmem %s186_s8, 128  ;;  %s804_s18 = smov [#allocation2]  }
  0x18   : > { %p708_p5 = scmp.ne.s32.totalorder %s186_s8, %s707_s11  ;;  %s712_s19 = sshll.u32 %s804_s18, 4  ;;  %s713_s19 = int_to_ptr.vmem [resolvable:$false] %s712_s19 }
  0x19   : > { %s714_s21 = scalar_lea.vmem %s713_s19, 256  ;;  %p715_p10 = scmp.lt.s32.totalorder %s186_s8, %s713_s19 }
  0x1a   : > { %p710_p6 = pnand %p708_p5, %p696_p3  ;;  %p716_p12 = scmp.lt.s32.totalorder %s714_s21, %s707_s11 }
  0x1c   : > { %p711_p7 = pneg %p710_p6  ;;  %p717_p4 = por %p716_p12, %p715_p10 }
  0x1e   : > { %p718_p13 = pnand %p717_p4, %p711_p7 }
  0x20   : > { %721 = shalt.err (!%p718_p13)
}
  0x21   : > { %614 = dma.hbm_to_vmem [thread:$0]  (!%p911_p0), %s183_s6, 128, %s186_s8, %s172_s10  }
  0x22   : > { %p191_p11 = pnand %p597_p1, %p190_p2 }
  0x23   : > { %s926_s22 = sand.u32 (!%p191_p11), 1, %s786_s13  }
  0x24   : > { %194 = sbr.rel (%p191_p11) target bundleno = 328 (0x148), region = 32  ;;  %s598_s23 = sshll.u32 (!%p191_p11), %s926_s22, 3 }
  0x25   : > { %s197_s28 = scalar_lea.sflag (!%p191_p11), [#allocation3], %s926_s22  ;;  %s200_s29 = scalar_lea.vmem (!%p191_p11), [#allocation2], %s598_s23 }
  0x29   : > { %773 = dma.done.wait (%p887_p8), %s197_s28, 128  }
  0x2a   : > { %775 = vsyncadd (%p887_p8), %s197_s28, 4294967168  ;;  %v805_v0 = vmov 1   ;;  %v806_v1 = vmov 0   ;;  %v936_v2 = vld [vmem:[%s200_s29] sm:$0xff]  ;;  %s807_s30 = smov 112   ;;  %s808_s4 = smov 16   ;;  %v242_v12 = vlaneseq }
  0x2b   : > { %684 = vset.pattern.permute.xlu1 %v805_v0  ;;  %683 = vset.pattern.permute.xlu0 %v806_v1  ;;  %v278_v3 = vcombine.high %v936_v2, %v936_v2  ;;  %v240_v4 = vld [vmem:[%s1098_s1] sm:$0xf]  ;;  %v809_v5 = vmov 2   ;;  %v810_v6 = vmov 4   ;;  %s811_s6 = smov 1   ;;  %v812_v7 = vmov 3  }
  0x2c   : > { %293 = vrot.lane.b32.xlu1 %v936_v2, %s807_s30  ;;  %280 = vrot.lane.b32.xlu0 %v936_v2, %s808_s4  ;;  %v813_v8 = vmov 6   ;;  %v814_v9 = vmov 5   ;;  %s815_s7 = smov 127   ;;  %v816_v10 = vmov 7   ;;  %v817_v11 = vmov 8   ;;  %s606_s10 = sshll.u32 %s794_s15, 7 }
  0x2d   : > { %v951_v13 = vand.u32 127, %v242_v12  ;;  %v241_v21 = vld [vmem:[%s1099_s2] sm:$0xf]  ;;  %v818_v45 = vmov 839922192   ;;  %v386_v49 = vshrl.u32 %v242_v12, 7  ;;  %s472_s28 = scalar_lea.hbm %s1100_s3, %s606_s10 }
  0x2e   : > { %v383_v46 = vunpack.c.l.s4 %v818_v45  ;;  %s230_s11 = scalar_lea.vmem [#allocation5], %s598_s23  ;;  %s458_s29 = scalar_lea.sflag [#allocation4], %s926_s22 }
  0x2f   : > { %vm284_vm0 = vcmp.lt.s32.totalorder %v951_v13, 16  ;;  %vm297_vm1 = vcmp.lt.s32.totalorder %v951_v13, 112  ;;  %vm273_vm2 = vcmp.ge.s32.totalorder %v951_v13, 16  ;;  %v244_v25 = vadd.s32 128, %v951_v13  ;;  %s474_s18 = sshll.u32 %s230_s11, 4  ;;  %s475_s18 = int_to_ptr.vmem [resolvable:$true] %s474_s18 }
  0x30   : > { %295 = vrot.lane.b32.xlu1 %v278_v3, %s807_s30  ;;  %282 = vrot.lane.b32.xlu0 %v278_v3, %s808_s4  ;;  %vm310_vm4 = vcmp.lt.s32.totalorder %v951_v13, 1  ;;  %vm323_vm6 = vcmp.lt.s32.totalorder %v951_v13, 127  ;;  %v384_v48 = vunpack.c.0.s8 %v383_v46  ;;  %v249_v51 = vand.u32 15, %v951_v13  ;;  %s722_s30 = scalar_lea.vmem %s475_s18, 128  ;;  %s819_s4 = smov [#allocation5]  }
  0x31   : > { %vm276_vm3 = vcmp.lt.s32.totalorder %v244_v25, 240  ;;  %v256_v30 = vand.u32 15, %v244_v25  ;;  %p723_p8 = scmp.ne.s32.totalorder %s475_s18, %s722_s30  ;;  %s726_s15 = sshll.u32 %s819_s4, 4  ;;  %s727_s15 = int_to_ptr.vmem [resolvable:$false] %s726_s15 }
  0x32   : > { %v387_v52 = vsub.s32 %v384_v48, %v386_v49  ;;  %vm1001_vm8 = vcmp.gt.s32.totalorder %v249_v51, 0  ;;  %vm1017_vm9 = vcmp.lt.s32.totalorder %v249_v51, 15  ;;  %s728_s23 = scalar_lea.vmem %s727_s15, 256  ;;  %p729_p0 = scmp.lt.s32.totalorder %s475_s18, %s727_s15 }
  0x33   : > { %vm981_vm5 = vcmp.gt.s32.totalorder %v256_v30, 0  ;;  %vm992_vm7 = vcmp.lt.s32.totalorder %v256_v30, 15  ;;  %p724_p11 = pnand %p723_p8, %p891_p9  ;;  %p730_p1 = scmp.lt.s32.totalorder %s728_s23, %s722_s30 }
  0x34   : > { %340 = vperm.xlu1 %684, %v240_v4   ;;  %334 = vperm.xlu0 %683, %v240_v4  }
  0x35   : > { %p725_p12 = pneg %p724_p11  ;;  %p731_p2 = por %p730_p1, %p729_p0 }
  0x37   : > { %p732_p3 = pnand %p731_p2, %p725_p12 }
  0x38   : > { %685 = vset.pattern.permute.xlu1 %v809_v5  ;;  %686 = vset.pattern.permute.xlu0 %v810_v6 }
  0x39   : > { %348 = vperm.xlu1 %685, %v240_v4   ;;  %380 = vperm.xlu0 %686, %v240_v4  }
  0x3d   : > { %357 = vrot.lane.b32.xlu1 %v278_v3, %s811_s6  ;;  %687 = vset.pattern.permute.xlu0 %v812_v7 }
  0x3e   : > { %689 = vset.pattern.permute.xlu1 %v813_v8  ;;  %372 = vperm.xlu0 %687, %v240_v4  }
  0x41   : > { %421 = vperm.xlu1 %689, %v240_v4  }
  0x42   : > { %355 = vrot.lane.b32.xlu0 %v936_v2, %s811_s6 }
  0x43   : > { %688 = vset.pattern.permute.xlu0 %v814_v9 }
  0x45   : > { %363 = vrot.lane.b32.xlu1 %v936_v2, %s815_s7 }
  0x46   : > { %690 = vset.pattern.permute.xlu1 %v816_v10  ;;  %397 = vperm.xlu0 %688, %v240_v4  }
  0x49   : > { %429 = vperm.xlu1 %690, %v240_v4  }
  0x4a   : > { %365 = vrot.lane.b32.xlu0 %v278_v3, %s815_s7 }
  0x4b   : > { %691 = vset.pattern.permute.xlu0 %v817_v11 }
  0x9e   : > { %v281_v14 = vpop.permute.xlu0 %280  ;;  %v294_v15 = vpop.permute.xlu1 %293 }
  0xa2   : > { %v283_v16 = vpop.permute.xlu0 %282  ;;  %v296_v17 = vpop.permute.xlu1 %295 }
  0xa3   : > { %v285_v18 = vsel %vm284_vm0, %v281_v14, %v283_v16  ;;  %v957_v19 = vsel %vm297_vm1, %v294_v15, %v296_v17  ;;  %v286_v20 = vsel %vm284_vm0, %v283_v16, %v281_v14  ;;  %v299_v26 = vsel %vm297_vm1, %v296_v17, %v294_v15 }
  0xa4   : > { %308 = vrot.lane.b32.xlu1 %v285_v18, %s811_s6  ;;  %404 = vrot.lane.b32.xlu0 %v957_v19, %s811_s6  ;;  %v291_v22 = vsel %vm273_vm2, %v286_v20, 0.0  ;;  %v974_v29 = vsel %vm276_vm3, %v299_v26, 0.0 }
  0xa8   : > { %321 = vrot.lane.b32.xlu1 %v285_v18, %s815_s7  ;;  %437 = vperm.xlu0 %691, %v240_v4  }
  0xac   : > { %306 = vrot.lane.b32.xlu1 %v291_v22, %s811_s6  ;;  %692 = vset.pattern.permute.xlu0 %v806_v1 }
  0xad   : > { %446 = vperm.xlu0 %692, %v241_v21  }
  0xaf   : > { %v341_v23 = vpop.permute.xlu1 %340  ;;  %v335_v24 = vpop.permute.xlu0 %334 }
  0xb0   : > { %319 = vrot.lane.b32.xlu1 %v291_v22, %s815_s7  ;;  %v343_v58 = vmul.f32 %v341_v23, %v291_v22  ;;  %v344_v61 = vmul.f32 %v341_v23, %v285_v18 }
  0xb4   : > { %v349_v27 = vpop.permute.xlu1 %348  ;;  %412 = vrot.lane.b32.xlu1 %v957_v19, %s815_s7  ;;  %v381_v28 = vpop.permute.xlu0 %380 }
  0xb5   : > { %v388_v62 = vrot.slane %v381_v28, %v387_v52 }
  0xb7   : > { %v390_v12 = vmul.f32 %v388_v62, %v936_v2 }
  0xb8   : > { %406 = vrot.lane.b32.xlu1 %v974_v29, %s811_s6  ;;  %v358_v31 = vpop.permute.xlu1 %357 }
  0xb9   : > { %v373_v32 = vpop.permute.xlu0 %372 }
  0xbc   : > { %414 = vrot.lane.b32.xlu1 %v974_v29, %s815_s7  ;;  %v987_v36 = vpop.permute.xlu1 %421 }
  0xbd   : > { %v356_v34 = vpop.permute.xlu0 %355 }
  0xbe   : > { %v359_v35 = vsel %vm310_vm4, %v356_v34, %v358_v31  ;;  %v360_v55 = vsel %vm310_vm4, %v358_v31, %v356_v34 }
  0xbf   : > { %v362_v37 = vsel %vm981_vm5, %v359_v35, 0.0  ;;  %v361_v1 = vsel %vm1001_vm8, %v360_v55, 0.0 }
  0xc0   : > { %v364_v40 = vpop.permute.xlu1 %363  ;;  %v375_v16 = vmul.f32 %v373_v32, %v361_v1  ;;  %v376_v18 = vmul.f32 %v373_v32, %v362_v37 }
  0xc1   : > { %v398_v38 = vpop.permute.xlu0 %397 }
  0xc4   : > { %v430_v44 = vpop.permute.xlu1 %429 }
  0xc5   : > { %v366_v41 = vpop.permute.xlu0 %365  ;;  %v432_v46 = vmul.f32 %v430_v44, %v957_v19 }
  0xc6   : > { %v368_v42 = vsel %vm323_vm6, %v366_v41, %v364_v40  ;;  %v367_v9 = vsel %vm323_vm6, %v364_v40, %v366_v41 }
  0xc7   : > { %v370_v43 = vsel %vm992_vm7, %v368_v42, 0.0  ;;  %v369_v20 = vsel %vm1017_vm9, %v367_v9, 0.0 }
  0xc8   : > { %v400_v28 = vmul.f32 %v398_v38, %v369_v20  ;;  %v401_v30 = vmul.f32 %v398_v38, %v370_v43 }
 0x116   : > { %v309_v47 = vpop.permute.xlu1 %308  ;;  %v405_v23 = vpop.permute.xlu0 %404 }
 0x11a   : > { %v322_v50 = vpop.permute.xlu1 %321 }
 0x11e   : > { %v307_v53 = vpop.permute.xlu1 %306 }
 0x11f   : > { %v311_v56 = vsel %vm310_vm4, %v307_v53, %v309_v47  ;;  %v312_v57 = vsel %vm310_vm4, %v309_v47, %v307_v53  ;;  %v433_v47 = vmul.f32 %v430_v44, %v974_v29 }
 0x120   : > { %v317_v59 = vsel %vm1001_vm8, %v312_v57, 0.0  ;;  %v318_v60 = vsel %vm981_vm5, %v311_v56, 0.0 }
 0x121   : > { %v337_v63 = vmul.f32 %v335_v24, %v317_v59  ;;  %v338_v0 = vmul.f32 %v335_v24, %v318_v60  ;;  %v392_v24 = vcombine.high %v390_v12, %v390_v12 }
 0x122   : > { %v320_v4 = vpop.permute.xlu1 %319 }
 0x123   : > { %v345_v5 = vadd.f32 %v343_v58, %v337_v63  ;;  %v346_v6 = vadd.f32 %v344_v61, %v338_v0  ;;  %v324_v7 = vsel %vm323_vm6, %v320_v4, %v322_v50  ;;  %v325_v8 = vsel %vm323_vm6, %v322_v50, %v320_v4  ;;  %v438_v41 = vpop.permute.xlu0 %437 }
 0x124   : > { %v330_v10 = vsel %vm1017_vm9, %v324_v7, 0.0  ;;  %v331_v11 = vsel %vm992_vm7, %v325_v8, 0.0 }
 0x125   : > { %v351_v14 = vmul.f32 %v349_v27, %v330_v10  ;;  %v352_v15 = vmul.f32 %v349_v27, %v331_v11 }
 0x126   : > { %v413_v17 = vpop.permute.xlu1 %412 }
 0x127   : > { %v353_v21 = vadd.f32 %v351_v14, %v345_v5  ;;  %v354_v22 = vadd.f32 %v352_v15, %v346_v6 }
 0x128   : > { %v447_v54 = vpop.permute.xlu0 %446 }
 0x129   : > { %v377_v25 = vadd.f32 %v375_v16, %v353_v21  ;;  %v378_v26 = vadd.f32 %v376_v18, %v354_v22 }
 0x12a   : > { %v407_v31 = vpop.permute.xlu1 %406 }
 0x12b   : > { %v394_v34 = vadd.f32 %v390_v12, %v377_v25  ;;  %v395_v35 = vadd.f32 %v392_v24, %v378_v26  ;;  %v408_v27 = vsel %vm310_vm4, %v405_v23, %v407_v31  ;;  %v409_v32 = vsel %vm310_vm4, %v407_v31, %v405_v23 }
 0x12c   : > { %v410_v37 = vsel %vm1001_vm8, %v409_v32, 0.0  ;;  %v411_v40 = vsel %vm981_vm5, %v408_v27, 0.0 }
 0x12d   : > { %v402_v42 = vadd.f32 %v400_v28, %v394_v34  ;;  %v403_v45 = vadd.f32 %v401_v30, %v395_v35  ;;  %v424_v38 = vmul.f32 %v987_v36, %v410_v37  ;;  %v425_v43 = vmul.f32 %v987_v36, %v411_v40 }
 0x12e   : > { %v415_v48 = vpop.permute.xlu1 %414 }
 0x12f   : > { %v426_v49 = vadd.f32 %v424_v38, %v402_v42  ;;  %v427_v50 = vadd.f32 %v425_v43, %v403_v45  ;;  %v416_v33 = vsel %vm323_vm6, %v413_v17, %v415_v48  ;;  %v417_v51 = vsel %vm323_vm6, %v415_v48, %v413_v17 }
 0x130   : > { %v418_v52 = vsel %vm1017_vm9, %v416_v33, 0.0  ;;  %v419_v36 = vsel %vm992_vm7, %v417_v51, 0.0 }
 0x131   : > { %v440_v19 = vmul.f32 %v438_v41, %v418_v52  ;;  %v441_v53 = vmul.f32 %v438_v41, %v419_v36  ;;  %v434_v29 = vadd.f32 %v432_v46, %v426_v49  ;;  %v435_v44 = vadd.f32 %v433_v47, %v427_v50 }
 0x133   : > { %v442_v55 = vadd.f32 %v440_v19, %v434_v29  ;;  %v443_v56 = vadd.f32 %v441_v53, %v435_v44 }
 0x135   : > { %v449_v57 = vadd.f32 %v447_v54, %v442_v55  ;;  %v450_v58 = vadd.f32 %v447_v54, %v443_v56 }
 0x137   : > { %v453_v13 = vcombine.low %v449_v57, %v450_v58 }
 0x139   : > { %v455_v59 = vmax.f32 %v936_v2, %v453_v13 }
 0x13b   : > { %456 = vst [vmem:[%s230_s11] sm:$0xff] %v455_v59 }
 0x13c   : > { %735 = shalt.err (!%p732_p3)
}
 0x13d   : > { %s736_s5 = scalar_lea.hbm %s472_s28, 128  ;;  %s740_s6 = scalar_lea.hbm %s1100_s3, 256 }
 0x13e   : > { %p737_p5 = scmp.ne.s32.totalorder %s472_s28, %s736_s5  ;;  %p741_p10 = scmp.lt.s32.totalorder %s472_s28, %s1100_s3 }
 0x13f   : > { %p742_p4 = scmp.lt.s32.totalorder %s740_s6, %s736_s5 }
 0x140   : > { %p738_p6 = pnand %p737_p5, %p891_p9 }
 0x141   : > { %p743_p13 = por %p742_p4, %p741_p10 }
 0x142   : > { %p739_p7 = pneg %p738_p6 }
 0x144   : > { %p744_p8 = pnand %p743_p13, %p739_p7 }
 0x146   : > { %747 = shalt.err (!%p744_p8)
}
 0x147   : > { %609 = dma.vmem_to_hbm [thread:$0]  (%p891_p9), %s475_s18, 128, %s472_s28, %s458_s29  }
 0x148 PF: > { %s486_s9 = sand.u32 1, %s782_s12   ;;  %p1114_p11 = scmp.ne.s32.totalorder %s1104_s27, 0 }
 0x149   : > { %p1115_p12 = scmp.ge.s32.totalorder %s802_s17, 2  ;;  %s487_s10 = scalar_lea.sflag [#allocation4], %s486_s9 }
 0x14b   : > { %p616_p0 = pnand %p1115_p12, %p1114_p11 }
 0x14d   : > { %p617_p1 = pneg %p616_p0 }
 0x14f   : > { %777 = dma.done.wait (%p617_p1), %s487_s10, 128  }
 0x150   : > { %779 = vsyncadd (%p617_p1), %s487_s10, 4294967168  ;;  %s19_s17 = sadd.s32 1, %s802_s17   ;;  %s1116_s12 = smov %s786_s13 }
 0x151   : > { %p16_p2 = scmp.ge.s32.totalorder %s19_s17, 4   ;;  %s1117_s13 = smov %s790_s14 }
 0x152   : > { %s1118_s14 = smov %s896_s26  ;;  %s1119_s15 = smov %s798_s16 }
 0x153   : > { %s1120_s16 = smov %s1122_s20  ;;  %18 = sbr.rel (!%p16_p2) target bundleno = 6 (0x6), region = 83 }
 0x158   :  { %492 = vsyncpa [#allocation3], 1 }
 0x159   :  { %494 = vsyncpa [#allocation3 + $0x1], 1 }
 0x15a   :  { %495 = vsyncpa [#allocation4], 1 }
 0x15b   :  { %497 = vsyncpa [#allocation4 + $0x1], 1 }

</bundles_post_ra>
